<compile_context>
chip_gen: v5e
topology: v5e:2x2
jax: 0.10.0
libtpu: 0.0.40
codegen_flags: <defaults>
</compile_context>

<pallas_src>
import functools

import jax
import jax.numpy as jnp
from jax.experimental import pallas as pl
from jax.experimental.pallas import tpu as pltpu


_SMALL_ELEMS = 1 << 20   # below ~1M elements, let XLA handle it (fusible, low latency)


def _clamp_kernel(x_ref, o_ref, *, min_val, max_val):
    x = x_ref[...]
    if min_val is not None:
        x = jnp.maximum(x, jnp.asarray(min_val, dtype=x.dtype))
    if max_val is not None:
        x = jnp.minimum(x, jnp.asarray(max_val, dtype=x.dtype))
    o_ref[...] = x


def _sublane_multiple(dtype):
    itemsize = jnp.dtype(dtype).itemsize
    if itemsize >= 4:
        return 8
    if itemsize == 2:
        return 16
    return 32


def _choose_lane(total):
    """Widest lane dim (multiple of 128) that divides `total`, else None."""
    for c in (4096, 2048, 1024, 512, 256, 128):
        if total % c == 0:
            return c
    return None


@functools.lru_cache(maxsize=1)
def _block_params():
    """(target_block_bytes, vmem_limit_bytes or None) per TPU generation."""
    try:
        kind = jax.devices()[0].device_kind.lower()
    except Exception:  # pragma: no cover - CPU/interpret fallback
        kind = ""
    if "v7" in kind:
        # 3.2 TB/s HBM: 8 MiB blocks amortize the per-step overhead to <10%.
        # 4x8 MiB double-buffered in+out = 32 MiB -> raise the scoped limit.
        return 8 * 1024 * 1024, 48 * 1024 * 1024
    if "v6" in kind:
        # 16 MiB double-buffered footprint fits the 32 MiB default limit.
        return 4 * 1024 * 1024, None
    # v5e (16 MiB default scoped VMEM) or unknown generation: stay conservative.
    return 2 * 1024 * 1024, None


def clamp_pallas(x, min_val=0.0, max_val=1.0, *, force_pallas=False,
                 donate_input=False):
    """Elementwise clamp(x, min, max) via a Pallas TPU kernel."""
    orig_shape = x.shape
    dtype = x.dtype
    total = x.size

    if total == 0:
        return x

    if not force_pallas and total < _SMALL_ELEMS:
        # Fast path: standalone XLA clip is already at the HBM roofline and
        # stays fusible with producers/consumers.
        return jnp.clip(x, min_val, max_val)

    lane = _choose_lane(total)
    pad = 0
    if lane is None:
        # Rare fallback: pad only to the next multiple of 128 (costs an extra
        # pad + slice pass over HBM, ~3x traffic; keep it as cheap as possible).
        pad = (-total) % 128
        lane = _choose_lane(total + pad)

    x_flat = x.reshape(-1)
    if pad:
        x_flat = jnp.pad(x_flat, (0, pad))
    padded_total = total + pad
    rows = padded_total // lane
    x2d = x_flat.reshape(rows, lane)

    itemsize = jnp.dtype(dtype).itemsize
    sub = _sublane_multiple(dtype)
    block_bytes, vmem_limit = _block_params()

    tile_rows = max(sub, (block_bytes // (lane * itemsize)) // sub * sub)
    if tile_rows >= rows:
        if rows >= 2 * sub:
            # Keep >= 2 grid steps so ("parallel",) can shard across v7x's 2 TCs.
            tile_rows = max(sub, (pl.cdiv(rows, 2) // sub) * sub)
        else:
            tile_rows = rows          # full-extent block, single grid step
    grid = (pl.cdiv(rows, tile_rows),)  # ragged last row-block masked by Pallas

    kernel = functools.partial(_clamp_kernel, min_val=min_val, max_val=max_val)

    cp_kwargs = dict(dimension_semantics=("parallel",))
    if vmem_limit is not None:
        cp_kwargs["vmem_limit_bytes"] = vmem_limit

    call_kwargs = {}
    if donate_input:
        # Same HBM traffic, but reuses the input allocation for the output
        # (clamp_-style). Only beneficial when the caller donates the buffer;
        # otherwise XLA inserts a defensive copy, so it is opt-in.
        call_kwargs["input_output_aliases"] = {0: 0}

    out2d = pl.pallas_call(
        kernel,
        out_shape=jax.ShapeDtypeStruct((rows, lane), dtype),
        grid=grid,
        in_specs=[pl.BlockSpec((tile_rows, lane), lambda i: (i, 0))],
        out_specs=pl.BlockSpec((tile_rows, lane), lambda i: (i, 0)),
        compiler_params=pltpu.CompilerParams(**cp_kwargs),
        **call_kwargs,
    )(x2d)

    out_flat = out2d.reshape(-1)
    if pad:
        out_flat = out_flat[:total]
    return out_flat.reshape(orig_shape)


class ClampPallas:
    """JAX/Pallas equivalent of the PyTorch Clamp module (no parameters)."""

    def __init__(self, min=0, max=1):
        # Bounds stored as given (supports one-sided clamp via None, like torch).
        self.min = min
        self.max = max

    def __call__(self, x):
        return clamp_pallas(x, self.min, self.max)


if __name__ == "__main__":
    key = jax.random.PRNGKey(0)
    k1, k2, k3 = jax.random.split(key, 3)

    module = ClampPallas(min=0, max=1)

    # Small NCHW input consistent with the PyTorch module's typical usage.
    x_small = jax.random.normal(k1, (2, 4, 16, 16), dtype=jnp.float32) * 2.0
    out_small = jax.block_until_ready(module(x_small))
    ref_small = jnp.clip(x_small, 0.0, 1.0)
    assert out_small.shape == x_small.shape and out_small.dtype == x_small.dtype
    assert jnp.allclose(out_small, ref_small), "mismatch (small, module path)"

    # Force the Pallas kernel on the small input (bypasses the fast path).
    out_forced = jax.block_until_ready(
        clamp_pallas(x_small, 0.0, 1.0, force_pallas=True)
    )
    assert jnp.allclose(out_forced, ref_small), "mismatch (small, forced Pallas path)"

    # Multi-row slab exercising a >=2-step parallel grid.
    x_med = jax.random.normal(k2, (4, 8, 32, 128), dtype=jnp.float32) * 3.0
    out_med = jax.block_until_ready(clamp_pallas(x_med, 0.0, 1.0, force_pallas=True))
    ref_med = jnp.clip(x_med, 0.0, 1.0)
    assert out_med.shape == x_med.shape and out_med.dtype == x_med.dtype
    assert jnp.allclose(out_med, ref_med), "mismatch (medium, Pallas path)"

    # bf16 sanity check (16-row sublane rounding path).
    x_bf16 = x_med.astype(jnp.bfloat16)
    out_bf16 = jax.block_until_ready(clamp_pallas(x_bf16, 0.0, 1.0, force_pallas=True))
    assert out_bf16.dtype == jnp.bfloat16
    assert jnp.allclose(out_bf16, jnp.clip(x_bf16, 0.0, 1.0)), "mismatch (bf16)"

    # Ragged size (not a multiple of 128) exercising the cheap pad fallback.
    x_rag = jax.random.normal(k3, (3, 5, 7), dtype=jnp.float32) * 2.0
    out_rag = jax.block_until_ready(clamp_pallas(x_rag, 0.0, 1.0, force_pallas=True))
    assert jnp.allclose(out_rag, jnp.clip(x_rag, 0.0, 1.0)), "mismatch (ragged pad path)"

    print("KERNEL_OK")
</pallas_src>

<mosaic_0001>
module attributes {stable_mosaic.version = 11 : i64} {
  func.func @_clamp_kernel(%arg0: i32, %arg1: memref<1x2048xf32, #tpu.memory_space<vmem>>, %arg2: memref<1x2048xf32, #tpu.memory_space<vmem>>) attributes {dimension_semantics = [#tpu.dimension_semantics<parallel>], iteration_bounds = array<i64: 1>, scalar_prefetch = 0 : i64, scratch_operands = 0 : i64, tpu.core_type = #tpu.core_type<tc>, window_params = [{transform_indices = @transform_0, window_bounds = array<i64: 1, 2048>}, {transform_indices = @transform_1, window_bounds = array<i64: 1, 2048>}]} {
    %c0 = arith.constant 0 : index
    %c0_0 = arith.constant 0 : index
    %0 = vector.load %arg1[%c0, %c0_0] : memref<1x2048xf32, #tpu.memory_space<vmem>>, vector<1x2048xf32>
    %cst = arith.constant 0.000000e+00 : f32
    %1 = vector.broadcast %cst : f32 to vector<1x2048xf32>
    %2 = arith.maximumf %0, %1 : vector<1x2048xf32>
    %cst_1 = arith.constant 1.000000e+00 : f32
    %3 = vector.broadcast %cst_1 : f32 to vector<1x2048xf32>
    %4 = arith.minimumf %2, %3 : vector<1x2048xf32>
    %c0_2 = arith.constant 0 : index
    %c0_3 = arith.constant 0 : index
    %5 = vector.load %arg2[%c0_2, %c0_3] : memref<1x2048xf32, #tpu.memory_space<vmem>>, vector<1x2048xf32>
    tpu.vector_store %arg2[%c0_2, %c0_3], %4 {strides = array<i32>} : memref<1x2048xf32, #tpu.memory_space<vmem>>, vector<1x2048xf32>,
    return
  }
  func.func @transform_0(%arg0: i32) -> (i32, i32) {
    %c0_i32 = arith.constant 0 : i32
    %c0_i32_0 = arith.constant 0 : i32
    return %arg0, %c0_i32 : i32, i32
  }
  func.func @transform_1(%arg0: i32) -> (i32, i32) {
    %c0_i32 = arith.constant 0 : i32
    %c0_i32_0 = arith.constant 0 : i32
    return %arg0, %c0_i32 : i32, i32
  }
}

</mosaic_0001>

<bundles_post_ra>
// kernel: tpu_custom_call.1
= control target key start
LH: loop header
LB: loop body
LE: loop exit
PB: predicated region body
PF: predicated region fallthrough
CT: control target
= control target key end

     0   :  { %6 = vsyncpa [#allocation3], 0  ;;  %s120_s0 = inlined_call_operand.hbm [shape: f32[1,2048], index: 0, kind: input, shape index: {}]   ;;  %s121_s1 = inlined_call_operand.hbm [shape: f32[1,2048], index: 1, kind: output, shape index: {}]  }
   0x1   :  { %7 = vsyncpa [#allocation4], 0  ;;  %s13_s8 = sshll.u32 %s120_s0, 4  ;;  %s102_s9 = smov [#allocation2]   ;;  %s14_s8 = int_to_ptr.hbm [resolvable:$true] %s13_s8 }
   0x2   :  { %s15_s10 = sshll.u32 %s102_s9, 4  ;;  %s16_s10 = int_to_ptr.vmem [resolvable:$true] %s15_s10 }
   0x3   :  { %18 = dma.hbm_to_vmem [thread:$0]  %s14_s8, 256, %s16_s10, [#allocation3]  }
   0x4   :  { %98 = dma.done.wait [#allocation3], 256  }
   0x5   :  { %99 = vsyncadd [#allocation3], 4294967040  ;;  %v23_v0 = vld [vmem:[#allocation2] sm:$0xff]  ;;  %v24_v1 = vld [vmem:[#allocation2 + $0x8] sm:$0xff]  ;;  %s103_s11 = smov [#allocation5]   ;;  %s38_s15 = sshll.u32 %s121_s1, 4  ;;  %s39_s15 = int_to_ptr.hbm [resolvable:$true] %s38_s15 }
   0x6   :  { %v25_v2 = vmax.f32 %v23_v0, 0.0  ;;  %v26_v3 = vmax.f32 %v24_v1, 0.0  ;;  %s36_s12 = sshll.u32 %s103_s11, 4  ;;  %s37_s12 = int_to_ptr.vmem [resolvable:$true] %s36_s12 }
   0x8   :  { %v27_v4 = vmin.f32 %v25_v2, 1.0  ;;  %v28_v5 = vmin.f32 %v26_v3, 1.0 }
   0xa   :  { %29 = vst [vmem:[#allocation5] sm:$0xff] %v27_v4 }
   0xb   :  { %30 = vst [vmem:[#allocation5 + $0x8] sm:$0xff] %v28_v5 }
   0xc   :  { %41 = dma.vmem_to_hbm [thread:$0]  %s37_s12, 256, %s39_s15, [#allocation4]  }
   0xd   :  { %100 = dma.done.wait [#allocation4], 256  }
   0xe   :  { %101 = vsyncadd [#allocation4], 4294967040 }
   0xf   :  { %46 = vsyncpa [#allocation3], 1 }
  0x10   :  { %47 = vsyncpa [#allocation4], 1 }

</bundles_post_ra>
